<compile_context>
chip_gen: v6e
topology: v6e:2x2x1
jax: 0.10.0
libtpu: 0.0.40
codegen_flags: <defaults>
</compile_context>

<pallas_src>
import jax
import jax.numpy as jnp
import numpy as np
from jax.experimental import pallas as pl
from jax.experimental.pallas import tpu as pltpu

# ---------------- problem sizes (small, consistent with the module) ----------
B = 2            # batch (number of bags)
N_TILES = 8      # SEQ_LEN / N_TILES
IN_FEATURES = 32
D_MODEL = 128    # d_model_attention
OUT_FEATURES = 1
OUT_PAD = 128    # lane-padded output width (sliced back to OUT_FEATURES)
M = B * N_TILES  # rows fed to the MXU per matmul

# params128 slab row layout (sublanes of a (P_ROWS, 128) f32 array)
_ROW_B_EMB = IN_FEATURES          # 32
_ROW_B_ATT = IN_FEATURES + 1      # 33
_ROW_B_GATE = IN_FEATURES + 2     # 34
_ROW_W_W = IN_FEATURES + 3        # 35  Linear(D,1) attention weight as a row
_ROW_W_MLP = IN_FEATURES + 4      # 36  Linear(D,1) final-mlp weight as a row
_ROW_B_MLP = IN_FEATURES + 5      # 37  b_mlp scalar at lane 0
P_ROWS = 40                       # padded to a multiple of 8 sublanes


def deepmil_kernel(x_ref, w_ag_ref, p_ref, out_ref):
    # x_ref:    (M, IN_FEATURES)          all bags, tiles collapsed on sublanes
    # w_ag_ref: (D_MODEL, 2*D_MODEL)      [w_att | w_gate]
    # p_ref:    (P_ROWS, 128)             w_emb + biases + D->1 weight rows
    p = p_ref[...]                                        # (P_ROWS, 128)
    w_emb = p[0:IN_FEATURES, :]                           # (F, D)
    b_emb = p[_ROW_B_EMB:_ROW_B_EMB + 1, :]               # (1, D)
    b_att = p[_ROW_B_ATT:_ROW_B_ATT + 1, :]               # (1, D)
    b_gate = p[_ROW_B_GATE:_ROW_B_GATE + 1, :]            # (1, D)
    w_w_row = p[_ROW_W_W:_ROW_W_W + 1, :]                 # (1, D)
    w_mlp_row = p[_ROW_W_MLP:_ROW_W_MLP + 1, :]           # (1, D)
    b_mlp = p[_ROW_B_MLP:_ROW_B_MLP + 1, 0:1]             # (1, 1)

    x = x_ref[...]                                        # (M, F)

    # tiles_emb: Linear(F -> D)
    emb = jnp.dot(x, w_emb, preferred_element_type=jnp.float32) + b_emb   # (M, D)

    # Gated attention: fused att+gate matmul -> one (M, 256) MXU pass
    hu = jnp.dot(emb, w_ag_ref[...], preferred_element_type=jnp.float32)  # (M, 2D)
    h = jnp.tanh(hu[:, :D_MODEL] + b_att)
    u = jax.nn.sigmoid(hu[:, D_MODEL:] + b_gate)
    g = h * u                                                             # (M, D)

    # attention logits: VPU multiply + lane reduction (no D->1 MXU matmul).
    # '+ b_w' dropped: a constant shift cancels in the softmax below.
    g3 = g.reshape(B, N_TILES, D_MODEL)
    emb3 = emb.reshape(B, N_TILES, D_MODEL)
    att = jnp.sum(g3 * w_w_row, axis=-1, keepdims=True)                   # (B, N, 1)

    # softmax over the tile axis, per bag
    att = att - jnp.max(att, axis=1, keepdims=True)
    e = jnp.exp(att)
    weights = e * pl.reciprocal(jnp.sum(e, axis=1, keepdims=True),
                                approx=False)                             # (B, N, 1)

    # pooled = weights^T @ emb   -> (B, D)
    pooled = jnp.sum(weights * emb3, axis=1)                              # (B, D)

    # final mlp Linear(D -> 1): VPU multiply + lane reduction, then a
    # lane-dense (B, OUT_PAD) store (sliced back to OUT_FEATURES outside).
    logit = jnp.sum(pooled * w_mlp_row, axis=-1, keepdims=True) + b_mlp   # (B, 1)
    out_ref[...] = jnp.broadcast_to(logit, (B, OUT_PAD))


def pack_params(params):
    """One-time consolidation of the 10 small parameter tensors into 2 slabs.

    Call this ONCE (outside the per-forward path) and reuse the result.
    """
    (w_emb, b_emb, w_att, b_att, w_gate, b_gate, w_w, b_w, w_mlp, b_mlp) = params
    del b_w  # constant shift before softmax -> no effect on the output

    w_ag = jnp.concatenate([w_att, w_gate], axis=1)                       # (D, 2D)

    p = np.zeros((P_ROWS, 128), np.float32)
    p[0:IN_FEATURES, :] = np.asarray(w_emb)
    p[_ROW_B_EMB, :] = np.asarray(b_emb)[0]
    p[_ROW_B_ATT, :] = np.asarray(b_att)[0]
    p[_ROW_B_GATE, :] = np.asarray(b_gate)[0]
    p[_ROW_W_W, :] = np.asarray(w_w)[:, 0]
    p[_ROW_W_MLP, :] = np.asarray(w_mlp)[:, 0]
    p[_ROW_B_MLP, 0] = np.asarray(b_mlp)[0, 0]
    return w_ag, jnp.asarray(p)


@jax.jit
def _deepmil_pallas(x2, w_ag, p128):
    out_padded = pl.pallas_call(
        deepmil_kernel,
        out_shape=jax.ShapeDtypeStruct((B, OUT_PAD), jnp.float32),
        in_specs=[pl.BlockSpec(memory_space=pltpu.MemorySpace.VMEM)] * 3,
        out_specs=pl.BlockSpec(memory_space=pltpu.MemorySpace.VMEM),
    )(x2, w_ag, p128)
    return out_padded[:, :OUT_FEATURES]


def deepmil_forward(x, packed_params):
    """x: (B, N_TILES, IN_FEATURES); packed_params: output of pack_params()."""
    w_ag, p128 = packed_params
    x2 = x.reshape(M, IN_FEATURES)   # collapse batch into the matmul M dimension
    return _deepmil_pallas(x2, w_ag, p128)


def reference_forward(x, params):
    """Pure-JAX reference mirroring the PyTorch forward (mask=None)."""
    (w_emb, b_emb, w_att, b_att, w_gate, b_gate, w_w, b_w, w_mlp, b_mlp) = params
    emb = jnp.einsum("bnf,fd->bnd", x, w_emb) + b_emb
    h = jnp.tanh(jnp.einsum("bnd,de->bne", emb, w_att) + b_att)
    u = jax.nn.sigmoid(jnp.einsum("bnd,de->bne", emb, w_gate) + b_gate)
    att = jnp.einsum("bnd,do->bno", h * u, w_w) + b_w             # (B, N, 1)
    w = jax.nn.softmax(att, axis=1)                               # (B, N, 1)
    pooled = jnp.einsum("bno,bnd->bd", w, emb)                    # (B, D)
    logits = pooled @ w_mlp + b_mlp                               # (B, OUT)
    return logits


def make_params(key):
    ks = jax.random.split(key, 10)
    s = 0.05
    w_emb = jax.random.normal(ks[0], (IN_FEATURES, D_MODEL), jnp.float32) * s
    b_emb = jax.random.normal(ks[1], (1, D_MODEL), jnp.float32) * s
    w_att = jax.random.normal(ks[2], (D_MODEL, D_MODEL), jnp.float32) * s
    b_att = jax.random.normal(ks[3], (1, D_MODEL), jnp.float32) * s
    w_gate = jax.random.normal(ks[4], (D_MODEL, D_MODEL), jnp.float32) * s
    b_gate = jax.random.normal(ks[5], (1, D_MODEL), jnp.float32) * s
    w_w = jax.random.normal(ks[6], (D_MODEL, 1), jnp.float32) * s
    b_w = jax.random.normal(ks[7], (1, 1), jnp.float32) * s
    w_mlp = jax.random.normal(ks[8], (D_MODEL, OUT_FEATURES), jnp.float32) * s
    b_mlp = jax.random.normal(ks[9], (1, OUT_FEATURES), jnp.float32) * s
    return (w_emb, b_emb, w_att, b_att, w_gate, b_gate, w_w, b_w, w_mlp, b_mlp)


if __name__ == "__main__":
    key = jax.random.PRNGKey(0)
    kx, kp = jax.random.split(key)
    x = jax.random.normal(kx, (B, N_TILES, IN_FEATURES), jnp.float32)
    params = make_params(kp)

    packed = pack_params(params)              # one-time, outside the call path
    logits = deepmil_forward(x, packed)
    logits = jax.block_until_ready(logits)

    ref = reference_forward(x, params)
    np.testing.assert_allclose(np.asarray(logits), np.asarray(ref),
                               rtol=1e-5, atol=1e-5)
    assert logits.shape == (B, OUT_FEATURES)
    print("KERNEL_OK")
</pallas_src>

<mosaic_0001>
module attributes {stable_mosaic.version = 11 : i64} {
  func.func @deepmil_kernel(%arg0: memref<16x32xf32, #tpu.memory_space<vmem>>, %arg1: memref<128x256xf32, #tpu.memory_space<vmem>>, %arg2: memref<40x128xf32, #tpu.memory_space<vmem>>, %arg3: memref<2x128xf32, #tpu.memory_space<vmem>>) attributes {dimension_semantics = [], scalar_prefetch = 0 : i64, scratch_operands = 0 : i64, tpu.core_type = #tpu.core_type<tc>} {
    %c0 = arith.constant 0 : index
    %c0_0 = arith.constant 0 : index
    %0 = vector.load %arg2[%c0, %c0_0] : memref<40x128xf32, #tpu.memory_space<vmem>>, vector<40x128xf32>
    %1 = vector.extract_strided_slice %0 {offsets = [0, 0], sizes = [32, 128], strides = [1, 1]} : vector<40x128xf32> to vector<32x128xf32>
    %2 = vector.extract_strided_slice %0 {offsets = [32, 0], sizes = [1, 128], strides = [1, 1]} : vector<40x128xf32> to vector<1x128xf32>
    %3 = vector.extract_strided_slice %0 {offsets = [33, 0], sizes = [1, 128], strides = [1, 1]} : vector<40x128xf32> to vector<1x128xf32>
    %4 = vector.extract_strided_slice %0 {offsets = [34, 0], sizes = [1, 128], strides = [1, 1]} : vector<40x128xf32> to vector<1x128xf32>
    %5 = vector.extract_strided_slice %0 {offsets = [35, 0], sizes = [1, 128], strides = [1, 1]} : vector<40x128xf32> to vector<1x128xf32>
    %6 = vector.extract_strided_slice %0 {offsets = [36, 0], sizes = [1, 128], strides = [1, 1]} : vector<40x128xf32> to vector<1x128xf32>
    %7 = vector.extract_strided_slice %0 {offsets = [37, 0], sizes = [1, 1], strides = [1, 1]} : vector<40x128xf32> to vector<1x1xf32>
    %c0_1 = arith.constant 0 : index
    %c0_2 = arith.constant 0 : index
    %8 = vector.load %arg0[%c0_1, %c0_2] : memref<16x32xf32, #tpu.memory_space<vmem>>, vector<16x32xf32>
    %cst = arith.constant dense<0.000000e+00> : vector<16x128xf32>
    %9 = tpu.matmul %8, %1, %cst {dimension_numbers = #tpu.dot_dimension_numbers<[1], [0], [0], [1], [0, 0, 1, 1], [], []>} : vector<16x32xf32>, vector<32x128xf32>, vector<16x128xf32> -> vector<16x128xf32>
    %10 = vector.broadcast %2 : vector<1x128xf32> to vector<16x128xf32>
    %11 = arith.addf %9, %10 : vector<16x128xf32>
    %c0_3 = arith.constant 0 : index
    %c0_4 = arith.constant 0 : index
    %12 = vector.load %arg1[%c0_3, %c0_4] : memref<128x256xf32, #tpu.memory_space<vmem>>, vector<128x256xf32>
    %cst_5 = arith.constant dense<0.000000e+00> : vector<16x256xf32>
    %13 = tpu.matmul %11, %12, %cst_5 {dimension_numbers = #tpu.dot_dimension_numbers<[1], [0], [0], [1], [0, 0, 1, 1], [], []>} : vector<16x128xf32>, vector<128x256xf32>, vector<16x256xf32> -> vector<16x256xf32>
    %14 = vector.extract_strided_slice %13 {offsets = [0, 0], sizes = [16, 128], strides = [1, 1]} : vector<16x256xf32> to vector<16x128xf32>
    %15 = vector.broadcast %3 : vector<1x128xf32> to vector<16x128xf32>
    %16 = arith.addf %14, %15 : vector<16x128xf32>
    %17 = math.tanh %16 : vector<16x128xf32>
    %18 = vector.extract_strided_slice %13 {offsets = [0, 128], sizes = [16, 128], strides = [1, 1]} : vector<16x256xf32> to vector<16x128xf32>
    %19 = vector.broadcast %4 : vector<1x128xf32> to vector<16x128xf32>
    %20 = arith.addf %18, %19 : vector<16x128xf32>
    %21 = arith.negf %20 : vector<16x128xf32>
    %22 = math.exp %21 : vector<16x128xf32>
    %cst_6 = arith.constant 1.000000e+00 : f32
    %23 = vector.broadcast %cst_6 : f32 to vector<16x128xf32>
    %24 = arith.addf %23, %22 : vector<16x128xf32>
    %25 = arith.divf %23, %24 : vector<16x128xf32>
    %26 = arith.mulf %17, %25 : vector<16x128xf32>
    %27 = vector.shape_cast %26 : vector<16x128xf32> to vector<2x8x128xf32>
    %28 = vector.shape_cast %11 : vector<16x128xf32> to vector<2x8x128xf32>
    %29 = vector.shape_cast %5 : vector<1x128xf32> to vector<1x1x128xf32>
    %30 = vector.broadcast %29 : vector<1x1x128xf32> to vector<2x8x128xf32>
    %31 = arith.mulf %27, %30 : vector<2x8x128xf32>
    %cst_7 = arith.constant dense<0.000000e+00> : vector<2x8xf32>
    %32 = vector.multi_reduction <add>, %31, %cst_7 [2] : vector<2x8x128xf32> to vector<2x8xf32>
    %33 = vector.shape_cast %32 : vector<2x8xf32> to vector<2x8x1xf32>
    %cst_8 = arith.constant dense<0xFF800000> : vector<2x1xf32>
    %34 = vector.multi_reduction <maximumf>, %33, %cst_8 [1] : vector<2x8x1xf32> to vector<2x1xf32>
    %35 = vector.shape_cast %34 : vector<2x1xf32> to vector<2x1x1xf32>
    %36 = vector.broadcast %35 : vector<2x1x1xf32> to vector<2x8x1xf32>
    %37 = arith.subf %33, %36 : vector<2x8x1xf32>
    %38 = math.exp %37 : vector<2x8x1xf32>
    %cst_9 = arith.constant dense<0.000000e+00> : vector<2x1xf32>
    %39 = vector.multi_reduction <add>, %38, %cst_9 [1] : vector<2x8x1xf32> to vector<2x1xf32>
    %40 = vector.shape_cast %39 : vector<2x1xf32> to vector<2x1x1xf32>
    %41 = tpu.reciprocal %40 : vector<2x1x1xf32> -> vector<2x1x1xf32>
    %42 = vector.broadcast %41 : vector<2x1x1xf32> to vector<2x8x1xf32>
    %43 = arith.mulf %38, %42 : vector<2x8x1xf32>
    %44 = vector.broadcast %43 : vector<2x8x1xf32> to vector<2x8x128xf32>
    %45 = arith.mulf %44, %28 : vector<2x8x128xf32>
    %cst_10 = arith.constant dense<0.000000e+00> : vector<2x128xf32>
    %46 = vector.multi_reduction <add>, %45, %cst_10 [1] : vector<2x8x128xf32> to vector<2x128xf32>
    %47 = vector.broadcast %6 : vector<1x128xf32> to vector<2x128xf32>
    %48 = arith.mulf %46, %47 : vector<2x128xf32>
    %cst_11 = arith.constant dense<0.000000e+00> : vector<2xf32>
    %49 = vector.multi_reduction <add>, %48, %cst_11 [1] : vector<2x128xf32> to vector<2xf32>
    %50 = vector.shape_cast %49 : vector<2xf32> to vector<2x1xf32>
    %51 = vector.broadcast %7 : vector<1x1xf32> to vector<2x1xf32>
    %52 = arith.addf %50, %51 : vector<2x1xf32>
    %53 = vector.shape_cast %52 : vector<2x1xf32> to vector<2x1xf32>
    %54 = vector.broadcast %53 : vector<2x1xf32> to vector<2x128xf32>
    %c0_12 = arith.constant 0 : index
    %c0_13 = arith.constant 0 : index
    %55 = vector.load %arg3[%c0_12, %c0_13] : memref<2x128xf32, #tpu.memory_space<vmem>>, vector<2x128xf32>
    tpu.vector_store %arg3[%c0_12, %c0_13], %54 {strides = array<i32>} : memref<2x128xf32, #tpu.memory_space<vmem>>, vector<2x128xf32>,
    return
  }
}

</mosaic_0001>

<bundles_post_ra>
// kernel: _deepmil_pallas.1
= control target key start
LH: loop header
LB: loop body
LE: loop exit
PB: predicated region body
PF: predicated region fallthrough
CT: control target
= control target key end

     0   :  { %8 = vsyncpa [#allocation3], 0  ;;  %s559_s0 = inlined_call_operand.hbm [shape: f32[16,32], index: 0, kind: input, shape index: {}]   ;;  %s560_s1 = inlined_call_operand.hbm [shape: f32[128,256], index: 1, kind: input, shape index: {}]   ;;  %s561_s2 = inlined_call_operand.hbm [shape: f32[40,128], index: 2, kind: input, shape index: {}]   ;;  %s562_s3 = inlined_call_operand.vmem [shape: f32[2,128], index: 3, kind: output, shape index: {}]  }
   0x1   :  { %9 = vsyncpa [#allocation5], 0  ;;  %s492_s12 = smov [#allocation4]  }
   0x2   :  { %s27_s13 = sshll.u32 %s492_s12, 4  ;;  %s28_s13 = int_to_ptr.vmem [resolvable:$true] %s27_s13 }
   0x3   :  { %s436_s14 = scalar_lea.vmem %s28_s13, 4096  ;;  %p441_p1 = scmp.lt.s32.totalorder %s28_s13, %s28_s13 }
   0x4   :  { %p437_p0 = scmp.ne.s32.totalorder %s28_s13, %s436_s14  ;;  %p442_p2 = scmp.lt.s32.totalorder %s436_s14, %s436_s14 }
   0x6   :  { %p443_p3 = por %p442_p2, %p441_p1 }
   0x8   :  { %p444_p4 = pnand %p443_p3, %p437_p0 }
   0xa   :  { %447 = shalt.err (!%p444_p4)
}
   0xb   :  { %s493_s15 = smov 256   ;;  %s494_s16 = smov 16  }
   0xc   :  { %33 = dma.hbm_to_vmem [thread:$0]  %s560_s1, 4096, %s28_s13, [#allocation5], %s493_s15, %s493_s15, %s494_s16  }
   0xd   :  { %s495_s19 = smov [#allocation2]  }
   0xe   :  { %s15_s20 = sshll.u32 %s495_s19, 4  ;;  %s16_s20 = int_to_ptr.vmem [resolvable:$true] %s15_s20 }
   0xf   :  { %s456_s21 = scalar_lea.vmem %s16_s20, 256  ;;  %p461_p6 = scmp.lt.s32.totalorder %s16_s20, %s16_s20 }
  0x10   :  { %p457_p5 = scmp.ne.s32.totalorder %s16_s20, %s456_s21  ;;  %p462_p7 = scmp.lt.s32.totalorder %s456_s21, %s456_s21 }
  0x12   :  { %p463_p8 = por %p462_p7, %p461_p6 }
  0x14   :  { %p464_p9 = pnand %p463_p8, %p457_p5 }
  0x16   :  { %467 = shalt.err (!%p464_p9)
}
  0x17   :  { %s496_s22 = smov 128   ;;  %s497_s23 = smov 8  }
  0x18   :  { %21 = dma.hbm_to_vmem [thread:$0]  %s559_s0, 256, %s16_s20, [#allocation3], %s496_s22, %s496_s22, %s497_s23  }
  0x19   :  { %s498_s26 = smov [#allocation6]  }
  0x1a   :  { %s39_s27 = sshll.u32 %s498_s26, 4  ;;  %s40_s27 = int_to_ptr.vmem [resolvable:$true] %s39_s27 }
  0x1b   :  { %s476_s1 = scalar_lea.vmem %s40_s27, 640  ;;  %p481_p11 = scmp.lt.s32.totalorder %s40_s27, %s40_s27 }
  0x1c   :  { %p477_p10 = scmp.ne.s32.totalorder %s40_s27, %s476_s1  ;;  %p482_p12 = scmp.lt.s32.totalorder %s476_s1, %s476_s1 }
  0x1e   :  { %p483_p13 = por %p482_p12, %p481_p11 }
  0x20   :  { %p484_p0 = pnand %p483_p13, %p477_p10 }
  0x22   :  { %487 = shalt.err (!%p484_p0)
}
  0x23   :  { %45 = dma.hbm_to_vmem [thread:$0]  %s561_s2, 640, %s40_s27, [#allocation5], %s496_s22, %s496_s22, %s497_s23  }
  0x24   :  { %488 = dma.done.wait [#allocation3], 256  }
  0x25   :  { %489 = vsyncadd [#allocation3], 4294967040 }
  0x26   :  { %490 = dma.done.wait [#allocation5], 4736  }
  0x27   :  { %491 = vsyncadd [#allocation5], 4294962560  ;;  %vm66_vm0 = vcmask 261120   ;;  %v58_v0 = vld [vmem:[#allocation6 + $0x18] sm:$0xff]  ;;  %v57_v1 = vld [vmem:[#allocation6 + $0x10] sm:$0xff]  ;;  %v499_v38 = vmov 0.0   ;;  %v62_v39 = vlaneseq }
  0x28   :  { %386 = vmatprep.subr.mxu0 %v58_v0  ;;  %v56_v2 = vld [vmem:[#allocation6 + $0x8] sm:$0xff]  ;;  %v60_v3 = vld [vmem:[#allocation2] sm:$0xff]  ;;  %v179_v4 = vld [vmem:[#allocation4 + $0xf8] sm:$0xff]  ;;  %244 = vmatprep.mubr.f32.mxu1 %v499_v38  ;;  %vm352_vm1 = vcmask 1041409   ;;  %vm355_vm2 = vcmask 1041408  }
  0x29   :  { %387 = vmatpush3.msra.mxu0 %v58_v0  ;;  %394 = vmatprep.mubr.msk.f32.mxu0 %vm66_vm0, %v60_v3  ;;  %v178_v5 = vld [vmem:[#allocation4 + $0xf0] sm:$0xff]  ;;  %v177_v6 = vld [vmem:[#allocation4 + $0xe8] sm:$0xff]  ;;  %v176_v7 = vld [vmem:[#allocation4 + $0xe0] sm:$0xff]  ;;  %v532_v40 = vshrl.u32 %v62_v39, 7 }
  0x2a   :  { %388 = vmatprep.subr.mxu0 %v57_v1  ;;  %180 = vmatprep.subr.mxu1 %v179_v4  ;;  %v55_v8 = vld [vmem:[#allocation6] sm:$0xff]  ;;  %v175_v9 = vld [vmem:[#allocation4 + $0xd8] sm:$0xff]  ;;  %v174_v10 = vld [vmem:[#allocation4 + $0xd0] sm:$0xff] }
  0x2b   :  { %389 = vmatpush3.msra.mxu0 %v57_v1  ;;  %181 = vmatpush1.msra.mxu1 %v178_v5  ;;  %v61_v11 = vld [vmem:[#allocation2 + $0x8] sm:$0xff]  ;;  %v173_v12 = vld [vmem:[#allocation4 + $0xc8] sm:$0xff]  ;;  %v172_v13 = vld [vmem:[#allocation4 + $0xc0] sm:$0xff]  ;;  %v64_v41 = vsub.s32 0, %v532_v40  ;;  %v267_v48 = vsub.s32 2, %v532_v40  ;;  %v259_v58 = vsub.s32 1, %v532_v40 }
  0x2c   :  { %390 = vmatprep.subr.mxu0 %v56_v2  ;;  %182 = vmatprep.subr.mxu1 %v177_v6  ;;  %v171_v14 = vld [vmem:[#allocation4 + $0xb8] sm:$0xff]  ;;  %v170_v15 = vld [vmem:[#allocation4 + $0xb0] sm:$0xff]  ;;  %v169_v16 = vld [vmem:[#allocation4 + $0xa8] sm:$0xff] }
  0x2d   :  { %391 = vmatpush3.msra.mxu0 %v56_v2  ;;  %183 = vmatpush1.msra.mxu1 %v176_v7  ;;  %v168_v17 = vld [vmem:[#allocation4 + $0xa0] sm:$0xff]  ;;  %v167_v18 = vld [vmem:[#allocation4 + $0x98] sm:$0xff]  ;;  %v166_v19 = vld [vmem:[#allocation4 + $0x90] sm:$0xff]  ;;  %v287_v2 = vsub.s32 3, %v532_v40 }
  0x2e   :  { %392 = vmatprep.subr.mxu0 %v55_v8  ;;  %184 = vmatprep.subr.mxu1 %v175_v9  ;;  %v165_v20 = vld [vmem:[#allocation4 + $0x88] sm:$0xff]  ;;  %v164_v21 = vld [vmem:[#allocation4 + $0x80] sm:$0xff]  ;;  %v163_v22 = vld [vmem:[#allocation4 + $0x78] sm:$0xff] }
  0x2f   :  { %393 = vmatpush3.msra.mxu0 %v55_v8  ;;  %185 = vmatpush1.msra.mxu1 %v174_v10  ;;  %v162_v23 = vld [vmem:[#allocation4 + $0x70] sm:$0xff]  ;;  %v161_v24 = vld [vmem:[#allocation4 + $0x68] sm:$0xff]  ;;  %v160_v25 = vld [vmem:[#allocation4 + $0x60] sm:$0xff] }
  0x30   :  { %395 = vmatmul.mubr.msk.f32.vlgmr.msra.gmra.mxu0 %vm66_vm0, %v61_v11  ;;  %186 = vmatprep.subr.mxu1 %v173_v12  ;;  %v159_v26 = vld [vmem:[#allocation4 + $0x58] sm:$0xff]  ;;  %v158_v27 = vld [vmem:[#allocation4 + $0x50] sm:$0xff]  ;;  %v157_v28 = vld [vmem:[#allocation4 + $0x48] sm:$0xff] }
  0x31   :  { %187 = vmatpush1.msra.mxu1 %v172_v13  ;;  %v156_v29 = vld [vmem:[#allocation4 + $0x40] sm:$0xff]  ;;  %v155_v30 = vld [vmem:[#allocation4 + $0x38] sm:$0xff]  ;;  %v154_v31 = vld [vmem:[#allocation4 + $0x30] sm:$0xff] }
  0x32   :  { %188 = vmatprep.subr.mxu1 %v171_v14  ;;  %v153_v32 = vld [vmem:[#allocation4 + $0x28] sm:$0xff]  ;;  %v152_v33 = vld [vmem:[#allocation4 + $0x20] sm:$0xff]  ;;  %v151_v34 = vld [vmem:[#allocation4 + $0x18] sm:$0xff] }
  0x33   :  { %189 = vmatpush1.msra.mxu1 %v170_v15  ;;  %v150_v35 = vld [vmem:[#allocation4 + $0x10] sm:$0xff]  ;;  %v149_v36 = vld [vmem:[#allocation4 + $0x8] sm:$0xff]  ;;  %v148_v37 = vld [vmem:[#allocation4] sm:$0xff] }
  0x34   :  { %190 = vmatprep.subr.mxu1 %v169_v16  ;;  %v535_v42 = vld [vmem:[#allocation6 + $0x20] sm:$0xff] }
  0x35   :  { %191 = vmatpush1.msra.mxu1 %v168_v17  ;;  %v65_v44 = vrot.slane %v535_v42, %v64_v41  ;;  %v268_v49 = vrot.slane %v535_v42, %v267_v48  ;;  %v260_v59 = vrot.slane %v535_v42, %v259_v58  ;;  %v288_v7 = vrot.slane %v535_v42, %v287_v2 }
  0x36   :  { %192 = vmatprep.subr.mxu1 %v167_v18  ;;  %v345_v58 = vsub.s32 4, %v532_v40 }
  0x37   :  { %193 = vmatpush1.msra.mxu1 %v166_v19 }
  0x38   :  { %194 = vmatprep.subr.mxu1 %v165_v20 }
  0x39   :  { %195 = vmatpush1.msra.mxu1 %v164_v21 }
  0x3a   :  { %196 = vmatprep.subr.mxu1 %v163_v22 }
  0x3b   :  { %197 = vmatpush1.msra.mxu1 %v162_v23 }
  0x3c   :  { %198 = vmatprep.subr.mxu1 %v161_v24 }
  0x3d   :  { %199 = vmatpush1.msra.mxu1 %v160_v25 }
  0x3e   :  { %200 = vmatprep.subr.mxu1 %v159_v26 }
  0x3f   :  { %201 = vmatpush1.msra.mxu1 %v158_v27 }
  0x40   :  { %202 = vmatprep.subr.mxu1 %v157_v28 }
  0x41   :  { %203 = vmatpush1.msra.mxu1 %v156_v29 }
  0x42   :  { %204 = vmatprep.subr.mxu1 %v155_v30 }
  0x43   :  { %205 = vmatpush1.msra.mxu1 %v154_v31 }
  0x44   :  { %206 = vmatprep.subr.mxu1 %v153_v32 }
  0x45   :  { %207 = vmatpush1.msra.mxu1 %v152_v33 }
  0x46   :  { %208 = vmatprep.subr.mxu1 %v151_v34 }
  0x47   :  { %209 = vmatpush1.msra.mxu1 %v150_v35 }
  0x48   :  { %210 = vmatprep.subr.mxu1 %v149_v36 }
  0x49   :  { %211 = vmatpush1.msra.mxu1 %v148_v37 }
  0xf0   :  { %v396_v43 = vpop.f32.mrf.mxu0 }
  0xf1   :  { %v541_v47 = vadd.f32 %v396_v43, %v65_v44 }
  0xf2   :  { %v139_v45 = vpop.f32.mrf.mxu0 }
  0xf3   :  { %v538_v46 = vadd.f32 %v139_v45, %v65_v44 }
  0xf5   :  { %245 = vmatmul.mubr.f32.vlgmr.msra.gmra.mxu1 %v538_v46 }
  0xf6   :  { %250 = vmatprep.mubr.f32.mxu1 %v499_v38 }
  0xf9   :  { %251 = vmatmul.mubr.f32.gmra.mxu1 %v541_v47 }
 0x1b5   :  { %v246_v50 = vpop.f32.mrf.mxu1 }
 0x1b6   :  { %v261_v0 = vadd.f32 %v260_v59, %v246_v50 }
 0x1b7   :  { %v248_v51 = vpop.f32.mrf.mxu1 }
 0x1b8   :  { %v269_v52 = vadd.f32 %v268_v49, %v248_v51 }
 0x1b9   :  { %v252_v53 = vpop.f32.mrf.mxu1 }
 0x1ba   :  { %v378_v54 = vmul.f32 -1.442695, %v269_v52  ;;  %v262_v61 = vadd.f32 %v260_v59, %v252_v53 }
 0x1bb   :  { %v254_v55 = vpop.f32.mrf.mxu1 }
 0x1bc   :  { %408 = vpow2.f32 %v378_v54  ;;  %v270_v56 = vadd.f32 %v268_v49, %v254_v55 }
 0x1be   :  { %v379_v57 = vmul.f32 -1.442695, %v270_v56 }
 0x1c0   :  { %410 = vpow2.f32 %v379_v57 }
 0x1c1   :  { %412 = vtanh.f32 %v262_v61 }
 0x1c9   :  { %v409_v60 = vpop.eup %408 }
 0x1ca   :  { %v277_v62 = vadd.f32 1.0, %v409_v60 }
 0x1cc   :  { %414 = vrcp.f32 %v277_v62 }
 0x1cd   :  { %v411_v63 = vpop.eup %410 }
 0x1ce   :  { %v278_v1 = vadd.f32 1.0, %v411_v63  ;;  %v413_v3 = vpop.eup %412  ;;  %v346_v63 = vrot.slane %v535_v42, %v345_v58 }
 0x1d0   :  { %416 = vrcp.f32 %v278_v1 }
 0x1d1   :  { %418 = vtanh.f32 %v261_v0 }
 0x1d9   :  { %v415_v4 = vpop.eup %414 }
 0x1dd   :  { %v417_v5 = vpop.eup %416 }
 0x1de   :  { %v284_v6 = vmul.f32 %v417_v5, %v413_v3  ;;  %v419_v8 = vpop.eup %418 }
 0x1df   :  { %v283_v10 = vmul.f32 %v419_v8, %v415_v4  ;;  %v361_v8 = vsub.s32 5, %v532_v40 }
 0x1e0   :  { %v290_v9 = vmul.f32 %v288_v7, %v284_v6 }
 0x1e1   :  { %v289_v11 = vmul.f32 %v288_v7, %v283_v10  ;;  %v500_v7 = vmov 0  }
 0x1e2   :  { %293 = vadd.xlane.f32.xlu0 %v290_v9  ;;  %406 = vset.pattern.permute.xlu1 %v500_v7  ;;  %v362_v9 = vrot.slane %v535_v42, %v361_v8 }
 0x1e3   :  { %407 = vset.pattern.permute.xlu0 %v500_v7 }
 0x1e6   :  { %291 = vadd.xlane.f32.xlu0 %v289_v11 }
 0x26b   :  { %v294_v12 = vpop.xlane.xlu0 %293 }
 0x26c   :  { %v301_v13 = vrot.slane %v294_v12, 4 }
 0x26e   :  { %v302_v14 = vmax.f32 %v294_v12, %v301_v13 }
 0x26f   :  { %v292_v15 = vpop.xlane.xlu0 %291 }
 0x270   :  { %v303_v16 = vrot.slane %v302_v14, 2  ;;  %v295_v17 = vrot.slane %v292_v15, 4 }
 0x272   :  { %v304_v18 = vmax.f32 %v302_v14, %v303_v16  ;;  %v296_v19 = vmax.f32 %v292_v15, %v295_v17 }
 0x274   :  { %v305_v20 = vrot.slane %v304_v18, 1  ;;  %v297_v21 = vrot.slane %v296_v19, 2 }
 0x276   :  { %v306_v22 = vmax.f32 %v304_v18, %v305_v20  ;;  %v298_v23 = vmax.f32 %v296_v19, %v297_v21 }
 0x278   :  { %v308_v24 = vsub.f32 %v294_v12, %v306_v22  ;;  %v299_v25 = vrot.slane %v298_v23, 1 }
 0x27a   :  { %v311_v26 = vmul.f32 1.442695, %v308_v24  ;;  %v300_v27 = vmax.f32 %v298_v23, %v299_v25 }
 0x27c   :  { %420 = vpow2.f32 %v311_v26  ;;  %v307_v28 = vsub.f32 %v292_v15, %v300_v27 }
 0x27e   :  { %v309_v29 = vmul.f32 1.442695, %v307_v28 }
 0x280   :  { %422 = vpow2.f32 %v309_v29 }
 0x289   :  { %v421_v30 = vpop.eup %420 }
 0x28a   :  { %v319_v31 = vrot.slane %v421_v30, 4 }
 0x28c   :  { %v320_v32 = vadd.f32 %v421_v30, %v319_v31 }
 0x28d   :  { %v423_v33 = vpop.eup %422 }
 0x28e   :  { %v313_v34 = vrot.slane %v423_v33, 4  ;;  %v321_v35 = vrot.slane %v320_v32, 2 }
 0x290   :  { %v314_v36 = vadd.f32 %v423_v33, %v313_v34  ;;  %v322_v37 = vadd.f32 %v321_v35, %v320_v32 }
 0x292   :  { %v315_v38 = vrot.slane %v314_v36, 2  ;;  %v323_v39 = vrot.slane %v322_v37, 1 }
 0x294   :  { %v316_v41 = vadd.f32 %v315_v38, %v314_v36  ;;  %v324_v43 = vadd.f32 %v323_v39, %v322_v37 }
 0x296   :  { %v317_v44 = vrot.slane %v316_v41, 1  ;;  %424 = vrcp.f32 %v324_v43 }
 0x298   :  { %v318_v45 = vadd.f32 %v317_v44, %v316_v41 }
 0x29a   :  { %426 = vrcp.f32 %v318_v45 }
 0x2a3   :  { %v425_v48 = vpop.eup %424 }
 0x2a4   :  { %v328_v49 = vmul.f32 %v425_v48, %v421_v30 }
 0x2a6   :  { %v330_v50 = vmul.f32 %v328_v49, %v541_v47 }
 0x2a7   :  { %v427_v51 = vpop.eup %426 }
 0x2a8   :  { %v327_v52 = vmul.f32 %v427_v51, %v423_v33  ;;  %v337_v53 = vrot.slane %v330_v50, 4 }
 0x2aa   :  { %v329_v54 = vmul.f32 %v327_v52, %v538_v46  ;;  %v338_v55 = vadd.f32 %v337_v53, %v330_v50 }
 0x2ac   :  { %v331_v56 = vrot.slane %v329_v54, 4  ;;  %v339_v57 = vrot.slane %v338_v55, 2 }
 0x2ae   :  { %v332_v59 = vadd.f32 %v331_v56, %v329_v54  ;;  %v340_v60 = vadd.f32 %v339_v57, %v338_v55 }
 0x2b0   :  { %v333_v61 = vrot.slane %v332_v59, 2  ;;  %v341_v62 = vrot.slane %v340_v60, 1 }
 0x2b2   :  { %v334_v0 = vadd.f32 %v333_v61, %v332_v59  ;;  %v342_v1 = vadd.f32 %v341_v62, %v340_v60 }
 0x2b4   :  { %v335_v2 = vrot.slane %v334_v0, 1  ;;  %v348_v47 = vmul.f32 %v346_v63, %v342_v1 }
 0x2b6   :  { %v336_v3 = vadd.f32 %v335_v2, %v334_v0  ;;  %v351_v5 = vrot.slane %v348_v47, 7 }
 0x2b8   :  { %v347_v4 = vmul.f32 %v346_v63, %v336_v3 }
 0x2ba   :  { %v353_v46 = vsel %vm352_vm1, %v351_v5, %v347_v4 }
 0x2bb   :  { %v356_v6 = vsel %vm355_vm2, %v353_v46, 0.0 }
 0x2bc   :  { %357 = vadd.xlane.f32.xlu1 %v356_v6 }
 0x345   :  { %v358_v10 = vpop.xlane.xlu1 %357 }
 0x346   :  { %v363_v11 = vadd.f32 %v362_v9, %v358_v10 }
 0x348   :  { %366 = vperm.xlu1 %406, %v363_v11  }
 0x3c3   :  { %v367_v12 = vpop.permute.xlu1 %366 }
 0x3c4   :  { %369 = vst [vmem:[%s562_s3] sm:$0x3] %v367_v12 }
 0x3c5   :  { %374 = vsyncpa [#allocation3], 1 }
 0x3c6   :  { %375 = vsyncpa [#allocation5], 1 }

</bundles_post_ra>
